<compile_context>
chip_gen: v7x
topology: tpu7x:2x2x1
jax: 0.10.0
libtpu: 0.0.40
codegen_flags: <defaults>
</compile_context>

<pallas_src>
import functools

import jax
import jax.numpy as jnp
from jax import lax
from jax.experimental import pallas as pl
from jax.experimental.pallas import tpu as pltpu

_CHUNK = 128                 # samples per bulk reduce (16 live f32 vregs/chunk)
_SMEM_IDX_LIMIT = 1 << 17    # per-array scalar-prefetch ceiling (~1 MiB SMEM)


def _round_up(x, m):
    return ((x + m - 1) // m) * m


def mf_kernel(u_idx_ref, s_idx_ref,        # scalar-prefetch (SMEM): (B_pad,) int32
              u_tab_ref, s_tab_ref,        # resident VMEM tables: (NU, Dp), (NS, Dp)
              out_ref,                     # (1, tile_b) lane-dense scores
              prod_ref,                    # VMEM scratch (CHUNK, Dp) f32
              *, tile_b, chunk, unroll):
    base = pl.program_id(0) * tile_b
    n_chunks = tile_b // chunk
    n_groups = chunk // unroll

    for c in range(n_chunks):                          # static & small (<= 4)
        c_base = base + c * chunk

        # ---- gather: one (1, Dp) product row per sample into VMEM scratch ----
        def gather(g, carry):
            j0 = pl.multiple_of(g * unroll, unroll)
            for t in range(unroll):                    # static unroll -> LLO window
                j = j0 + t
                u = u_idx_ref[c_base + j]              # SMEM scalar reads
                s = s_idx_ref[c_base + j]
                u_row = u_tab_ref[pl.ds(u, 1), :].astype(jnp.float32)
                s_row = s_tab_ref[pl.ds(s, 1), :].astype(jnp.float32)
                prod_ref[pl.ds(j, 1), :] = u_row * s_row
            return carry

        lax.fori_loop(0, n_groups, gather, 0)

        # ---- one bulk reduce + one transpose per chunk (no per-sample XLU) ----
        col = jnp.sum(prod_ref[...], axis=-1, keepdims=True)        # (chunk, 1)
        out_ref[:, pl.ds(c * chunk, chunk)] = jnp.transpose(col)    # (1, chunk)


def mf_forward(user_idxs, song_idxs, user_emb, song_emb, user_bias, song_bias,
               *, tile_b=None, unroll=8, table_dtype=jnp.float32):
    B = int(user_idxs.shape[0])
    NU, D = user_emb.shape
    NS = song_emb.shape[0]

    # --- fold biases into augmented tables; pad features to a lane multiple ---
    d_pad = _round_up(D + 2, 128)

    def augment(emb, col_a, col_b):
        aug = jnp.concatenate(
            [emb.astype(jnp.float32),
             col_a.reshape(-1, 1).astype(jnp.float32),
             col_b.reshape(-1, 1).astype(jnp.float32)], axis=1)
        aug = jnp.pad(aug, ((0, 0), (0, d_pad - (D + 2))))
        return aug.astype(table_dtype)

    u_aug = augment(user_emb, user_bias, jnp.ones((NU, 1), jnp.float32))  # [U|bu|1]
    s_aug = augment(song_emb, jnp.ones((NS, 1), jnp.float32), song_bias)  # [S|1|bs]

    # --- batch tiling: big tiles amortize the ~0.35us/step grid overhead ---
    if tile_b is None:
        tile_b = min(512, _round_up(max(B, 1), _CHUNK))
    assert tile_b % _CHUNK == 0 and _CHUNK % unroll == 0
    b_pad = _round_up(max(B, 1), tile_b)
    num_tiles = b_pad // tile_b
    u_idx = jnp.pad(user_idxs.astype(jnp.int32), (0, b_pad - B))
    s_idx = jnp.pad(song_idxs.astype(jnp.int32), (0, b_pad - B))

    if b_pad > _SMEM_IDX_LIMIT:
        raise NotImplementedError(
            f"batch of {B} indices exceeds the SMEM scalar-prefetch budget "
            "(see TODO(synk): per-tile index staging)")

    # --- VMEM budget: resident tables + scratch + output double buffers ---
    itemsize = jnp.dtype(table_dtype).itemsize
    table_bytes = (NU + NS) * d_pad * itemsize
    scratch_bytes = _CHUNK * d_pad * 4
    out_bytes = 2 * tile_b * 4
    needed = table_bytes + scratch_bytes + out_bytes + (2 << 20)  # + internal scratch
    try:
        vmem_cap = int(pltpu.get_tpu_info().vmem_capacity_bytes)
    except Exception:
        vmem_cap = 64 * 1024 * 1024      # conservative: v7x per-TensorCore VMEM
    # Batch axis is "parallel": on v7x each TensorCore holds private table
    # copies, so keep 25% headroom below the physical capacity.
    ceiling = int(0.75 * vmem_cap)
    if needed > ceiling:
        raise NotImplementedError(
            f"augmented tables need ~{table_bytes >> 20} MiB; too large to stay "
            f"VMEM-resident (budget ~{ceiling >> 20} MiB). "
            "See TODO(synk): streaming row-gather fallback / bf16 tables.")
    vmem_limit = max(needed, 8 * 1024 * 1024)

    grid_spec = pltpu.PrefetchScalarGridSpec(
        num_scalar_prefetch=2,                      # u_idx, s_idx -> SMEM
        grid=(num_tiles,),
        in_specs=[
            # Whole tables resident in VMEM (constant block index -> one DMA).
            pl.BlockSpec((NU, d_pad), lambda i, u, s: (0, 0)),
            pl.BlockSpec((NS, d_pad), lambda i, u, s: (0, 0)),
        ],
        out_specs=pl.BlockSpec((1, tile_b), lambda i, u, s: (i, 0)),
        scratch_shapes=[pltpu.VMEM((_CHUNK, d_pad), jnp.float32)],
    )

    cost = pl.CostEstimate(
        flops=2 * b_pad * d_pad,                    # mul + add per gathered lane
        transcendentals=0,
        bytes_accessed=int(table_bytes + 2 * b_pad * 4 + b_pad * 4),
    )

    kernel = functools.partial(mf_kernel, tile_b=tile_b, chunk=_CHUNK,
                               unroll=unroll)
    out = pl.pallas_call(
        kernel,
        out_shape=jax.ShapeDtypeStruct((num_tiles, tile_b), jnp.float32),
        grid_spec=grid_spec,
        compiler_params=pltpu.CompilerParams(
            dimension_semantics=("parallel",),      # independent tiles (2 TCs on v7x)
            vmem_limit_bytes=int(vmem_limit)),
        cost_estimate=cost,
    )(u_idx, s_idx, u_aug, s_aug)

    return out.reshape(-1)[:B]                      # (B,) -- .squeeze(1) equivalent


def mf_reference(user_idxs, song_idxs, user_emb, song_emb, user_bias, song_bias):
    ue = user_emb[user_idxs]                        # (B, D)
    se = song_emb[song_idxs]                        # (B, D)
    dot = jnp.sum(ue * se, axis=1, keepdims=True)
    bias = user_bias[user_idxs] + song_bias[song_idxs]
    return (dot + bias)[:, 0]


if __name__ == "__main__":
    num_users, num_songs, latent_dim, batch = 64, 128, 32, 8

    key = jax.random.PRNGKey(0)
    k_ue, k_se, k_ub, k_sb, k_u, k_s = jax.random.split(key, 6)

    # deterministic "nn.Embedding"-style parameters (standard normal init)
    user_emb = jax.random.normal(k_ue, (num_users, latent_dim), jnp.float32)
    song_emb = jax.random.normal(k_se, (num_songs, latent_dim), jnp.float32)
    user_bias = jax.random.normal(k_ub, (num_users, 1), jnp.float32)
    song_bias = jax.random.normal(k_sb, (num_songs, 1), jnp.float32)

    user_idxs = jax.random.randint(k_u, (batch,), 0, num_users, jnp.int32)
    song_idxs = jax.random.randint(k_s, (batch,), 0, num_songs, jnp.int32)

    score = mf_forward(user_idxs, song_idxs, user_emb, song_emb,
                       user_bias, song_bias)
    score = jax.block_until_ready(score)

    ref = mf_reference(user_idxs, song_idxs, user_emb, song_emb,
                       user_bias, song_bias)
    assert score.shape == (batch,)
    assert jnp.allclose(score, ref, atol=1e-5, rtol=1e-5)

    print("KERNEL_OK")
</pallas_src>

<mosaic_0001>
module attributes {stable_mosaic.version = 11 : i64} {
  func.func @mf_kernel(%arg0: i32, %arg1: memref<128xi32, #tpu.memory_space<smem>>, %arg2: memref<128xi32, #tpu.memory_space<smem>>, %arg3: memref<64x128xf32, #tpu.memory_space<vmem>>, %arg4: memref<128x128xf32, #tpu.memory_space<vmem>>, %arg5: memref<1x128xf32, #tpu.memory_space<vmem>>, %arg6: memref<128x128xf32, #tpu.memory_space<vmem>>) attributes {dimension_semantics = [#tpu.dimension_semantics<parallel>], iteration_bounds = array<i64: 1>, scalar_prefetch = 2 : i64, scratch_operands = 1 : i64, tpu.core_type = #tpu.core_type<tc>, window_params = [{pipeline_mode = #tpu.pipeline_mode<synchronous>, transform_indices = @transform_0, window_bounds = array<i64: 64, 128>}, {pipeline_mode = #tpu.pipeline_mode<synchronous>, transform_indices = @transform_1, window_bounds = array<i64: 128, 128>}, {transform_indices = @transform_2, window_bounds = array<i64: 1, 128>}]} {
    %c128_i32 = arith.constant 128 : i32
    %0 = arith.muli %arg0, %c128_i32 : i32
    %c0_i32 = arith.constant 0 : i32
    %1 = arith.addi %0, %c0_i32 : i32
    %c0_i32_0 = arith.constant 0 : i32
    %c16_i32 = arith.constant 16 : i32
    %2 = arith.addi %c0_i32_0, %c16_i32 : i32
    %c1_i32 = arith.constant 1 : i32
    scf.for %arg7 = %c0_i32_0 to %2 step %c1_i32  : i32 {
      %c8_i32 = arith.constant 8 : i32
      %8 = arith.muli %arg7, %c8_i32 : i32
      %9 = tpu.assume_multiple %8, 8 : i32
      %c0_i32_5 = arith.constant 0 : i32
      %10 = arith.addi %9, %c0_i32_5 : i32
      %11 = arith.addi %1, %10 : i32
      %12 = arith.index_cast %11 : i32 to index
      %13 = memref.load %arg1[%12] : memref<128xi32, #tpu.memory_space<smem>>
      %14 = arith.addi %1, %10 : i32
      %15 = arith.index_cast %14 : i32 to index
      %16 = memref.load %arg2[%15] : memref<128xi32, #tpu.memory_space<smem>>
      %17 = arith.index_cast %13 : i32 to index
      %c0_6 = arith.constant 0 : index
      %18 = vector.load %arg3[%17, %c0_6] : memref<64x128xf32, #tpu.memory_space<vmem>>, vector<1x128xf32>
      %19 = arith.index_cast %16 : i32 to index
      %c0_7 = arith.constant 0 : index
      %20 = vector.load %arg4[%19, %c0_7] : memref<128x128xf32, #tpu.memory_space<vmem>>, vector<1x128xf32>
      %21 = arith.mulf %18, %20 : vector<1x128xf32>
      %22 = arith.index_cast %10 : i32 to index
      %c0_8 = arith.constant 0 : index
      %23 = vector.load %arg6[%22, %c0_8] : memref<128x128xf32, #tpu.memory_space<vmem>>, vector<1x128xf32>
      tpu.vector_store %arg6[%22, %c0_8], %21 {strides = array<i32>} : memref<128x128xf32, #tpu.memory_space<vmem>>, vector<1x128xf32>,
      %c1_i32_9 = arith.constant 1 : i32
      %24 = arith.addi %9, %c1_i32_9 : i32
      %25 = arith.addi %1, %24 : i32
      %26 = arith.index_cast %25 : i32 to index
      %27 = memref.load %arg1[%26] : memref<128xi32, #tpu.memory_space<smem>>
      %28 = arith.addi %1, %24 : i32
      %29 = arith.index_cast %28 : i32 to index
      %30 = memref.load %arg2[%29] : memref<128xi32, #tpu.memory_space<smem>>
      %31 = arith.index_cast %27 : i32 to index
      %c0_10 = arith.constant 0 : index
      %32 = vector.load %arg3[%31, %c0_10] : memref<64x128xf32, #tpu.memory_space<vmem>>, vector<1x128xf32>
      %33 = arith.index_cast %30 : i32 to index
      %c0_11 = arith.constant 0 : index
      %34 = vector.load %arg4[%33, %c0_11] : memref<128x128xf32, #tpu.memory_space<vmem>>, vector<1x128xf32>
      %35 = arith.mulf %32, %34 : vector<1x128xf32>
      %36 = arith.index_cast %24 : i32 to index
      %c0_12 = arith.constant 0 : index
      %37 = vector.load %arg6[%36, %c0_12] : memref<128x128xf32, #tpu.memory_space<vmem>>, vector<1x128xf32>
      tpu.vector_store %arg6[%36, %c0_12], %35 {strides = array<i32>} : memref<128x128xf32, #tpu.memory_space<vmem>>, vector<1x128xf32>,
      %c2_i32 = arith.constant 2 : i32
      %38 = arith.addi %9, %c2_i32 : i32
      %39 = arith.addi %1, %38 : i32
      %40 = arith.index_cast %39 : i32 to index
      %41 = memref.load %arg1[%40] : memref<128xi32, #tpu.memory_space<smem>>
      %42 = arith.addi %1, %38 : i32
      %43 = arith.index_cast %42 : i32 to index
      %44 = memref.load %arg2[%43] : memref<128xi32, #tpu.memory_space<smem>>
      %45 = arith.index_cast %41 : i32 to index
      %c0_13 = arith.constant 0 : index
      %46 = vector.load %arg3[%45, %c0_13] : memref<64x128xf32, #tpu.memory_space<vmem>>, vector<1x128xf32>
      %47 = arith.index_cast %44 : i32 to index
      %c0_14 = arith.constant 0 : index
      %48 = vector.load %arg4[%47, %c0_14] : memref<128x128xf32, #tpu.memory_space<vmem>>, vector<1x128xf32>
      %49 = arith.mulf %46, %48 : vector<1x128xf32>
      %50 = arith.index_cast %38 : i32 to index
      %c0_15 = arith.constant 0 : index
      %51 = vector.load %arg6[%50, %c0_15] : memref<128x128xf32, #tpu.memory_space<vmem>>, vector<1x128xf32>
      tpu.vector_store %arg6[%50, %c0_15], %49 {strides = array<i32>} : memref<128x128xf32, #tpu.memory_space<vmem>>, vector<1x128xf32>,
      %c3_i32 = arith.constant 3 : i32
      %52 = arith.addi %9, %c3_i32 : i32
      %53 = arith.addi %1, %52 : i32
      %54 = arith.index_cast %53 : i32 to index
      %55 = memref.load %arg1[%54] : memref<128xi32, #tpu.memory_space<smem>>
      %56 = arith.addi %1, %52 : i32
      %57 = arith.index_cast %56 : i32 to index
      %58 = memref.load %arg2[%57] : memref<128xi32, #tpu.memory_space<smem>>
      %59 = arith.index_cast %55 : i32 to index
      %c0_16 = arith.constant 0 : index
      %60 = vector.load %arg3[%59, %c0_16] : memref<64x128xf32, #tpu.memory_space<vmem>>, vector<1x128xf32>
      %61 = arith.index_cast %58 : i32 to index
      %c0_17 = arith.constant 0 : index
      %62 = vector.load %arg4[%61, %c0_17] : memref<128x128xf32, #tpu.memory_space<vmem>>, vector<1x128xf32>
      %63 = arith.mulf %60, %62 : vector<1x128xf32>
      %64 = arith.index_cast %52 : i32 to index
      %c0_18 = arith.constant 0 : index
      %65 = vector.load %arg6[%64, %c0_18] : memref<128x128xf32, #tpu.memory_space<vmem>>, vector<1x128xf32>
      tpu.vector_store %arg6[%64, %c0_18], %63 {strides = array<i32>} : memref<128x128xf32, #tpu.memory_space<vmem>>, vector<1x128xf32>,
      %c4_i32 = arith.constant 4 : i32
      %66 = arith.addi %9, %c4_i32 : i32
      %67 = arith.addi %1, %66 : i32
      %68 = arith.index_cast %67 : i32 to index
      %69 = memref.load %arg1[%68] : memref<128xi32, #tpu.memory_space<smem>>
      %70 = arith.addi %1, %66 : i32
      %71 = arith.index_cast %70 : i32 to index
      %72 = memref.load %arg2[%71] : memref<128xi32, #tpu.memory_space<smem>>
      %73 = arith.index_cast %69 : i32 to index
      %c0_19 = arith.constant 0 : index
      %74 = vector.load %arg3[%73, %c0_19] : memref<64x128xf32, #tpu.memory_space<vmem>>, vector<1x128xf32>
      %75 = arith.index_cast %72 : i32 to index
      %c0_20 = arith.constant 0 : index
      %76 = vector.load %arg4[%75, %c0_20] : memref<128x128xf32, #tpu.memory_space<vmem>>, vector<1x128xf32>
      %77 = arith.mulf %74, %76 : vector<1x128xf32>
      %78 = arith.index_cast %66 : i32 to index
      %c0_21 = arith.constant 0 : index
      %79 = vector.load %arg6[%78, %c0_21] : memref<128x128xf32, #tpu.memory_space<vmem>>, vector<1x128xf32>
      tpu.vector_store %arg6[%78, %c0_21], %77 {strides = array<i32>} : memref<128x128xf32, #tpu.memory_space<vmem>>, vector<1x128xf32>,
      %c5_i32 = arith.constant 5 : i32
      %80 = arith.addi %9, %c5_i32 : i32
      %81 = arith.addi %1, %80 : i32
      %82 = arith.index_cast %81 : i32 to index
      %83 = memref.load %arg1[%82] : memref<128xi32, #tpu.memory_space<smem>>
      %84 = arith.addi %1, %80 : i32
      %85 = arith.index_cast %84 : i32 to index
      %86 = memref.load %arg2[%85] : memref<128xi32, #tpu.memory_space<smem>>
      %87 = arith.index_cast %83 : i32 to index
      %c0_22 = arith.constant 0 : index
      %88 = vector.load %arg3[%87, %c0_22] : memref<64x128xf32, #tpu.memory_space<vmem>>, vector<1x128xf32>
      %89 = arith.index_cast %86 : i32 to index
      %c0_23 = arith.constant 0 : index
      %90 = vector.load %arg4[%89, %c0_23] : memref<128x128xf32, #tpu.memory_space<vmem>>, vector<1x128xf32>
      %91 = arith.mulf %88, %90 : vector<1x128xf32>
      %92 = arith.index_cast %80 : i32 to index
      %c0_24 = arith.constant 0 : index
      %93 = vector.load %arg6[%92, %c0_24] : memref<128x128xf32, #tpu.memory_space<vmem>>, vector<1x128xf32>
      tpu.vector_store %arg6[%92, %c0_24], %91 {strides = array<i32>} : memref<128x128xf32, #tpu.memory_space<vmem>>, vector<1x128xf32>,
      %c6_i32 = arith.constant 6 : i32
      %94 = arith.addi %9, %c6_i32 : i32
      %95 = arith.addi %1, %94 : i32
      %96 = arith.index_cast %95 : i32 to index
      %97 = memref.load %arg1[%96] : memref<128xi32, #tpu.memory_space<smem>>
      %98 = arith.addi %1, %94 : i32
      %99 = arith.index_cast %98 : i32 to index
      %100 = memref.load %arg2[%99] : memref<128xi32, #tpu.memory_space<smem>>
      %101 = arith.index_cast %97 : i32 to index
      %c0_25 = arith.constant 0 : index
      %102 = vector.load %arg3[%101, %c0_25] : memref<64x128xf32, #tpu.memory_space<vmem>>, vector<1x128xf32>
      %103 = arith.index_cast %100 : i32 to index
      %c0_26 = arith.constant 0 : index
      %104 = vector.load %arg4[%103, %c0_26] : memref<128x128xf32, #tpu.memory_space<vmem>>, vector<1x128xf32>
      %105 = arith.mulf %102, %104 : vector<1x128xf32>
      %106 = arith.index_cast %94 : i32 to index
      %c0_27 = arith.constant 0 : index
      %107 = vector.load %arg6[%106, %c0_27] : memref<128x128xf32, #tpu.memory_space<vmem>>, vector<1x128xf32>
      tpu.vector_store %arg6[%106, %c0_27], %105 {strides = array<i32>} : memref<128x128xf32, #tpu.memory_space<vmem>>, vector<1x128xf32>,
      %c7_i32 = arith.constant 7 : i32
      %108 = arith.addi %9, %c7_i32 : i32
      %109 = arith.addi %1, %108 : i32
      %110 = arith.index_cast %109 : i32 to index
      %111 = memref.load %arg1[%110] : memref<128xi32, #tpu.memory_space<smem>>
      %112 = arith.addi %1, %108 : i32
      %113 = arith.index_cast %112 : i32 to index
      %114 = memref.load %arg2[%113] : memref<128xi32, #tpu.memory_space<smem>>
      %115 = arith.index_cast %111 : i32 to index
      %c0_28 = arith.constant 0 : index
      %116 = vector.load %arg3[%115, %c0_28] : memref<64x128xf32, #tpu.memory_space<vmem>>, vector<1x128xf32>
      %117 = arith.index_cast %114 : i32 to index
      %c0_29 = arith.constant 0 : index
      %118 = vector.load %arg4[%117, %c0_29] : memref<128x128xf32, #tpu.memory_space<vmem>>, vector<1x128xf32>
      %119 = arith.mulf %116, %118 : vector<1x128xf32>
      %120 = arith.index_cast %108 : i32 to index
      %c0_30 = arith.constant 0 : index
      %121 = vector.load %arg6[%120, %c0_30] : memref<128x128xf32, #tpu.memory_space<vmem>>, vector<1x128xf32>
      tpu.vector_store %arg6[%120, %c0_30], %119 {strides = array<i32>} : memref<128x128xf32, #tpu.memory_space<vmem>>, vector<1x128xf32>,
    }
    %c16_i32_1 = arith.constant 16 : i32
    %c0 = arith.constant 0 : index
    %c0_2 = arith.constant 0 : index
    %3 = vector.load %arg6[%c0, %c0_2] : memref<128x128xf32, #tpu.memory_space<vmem>>, vector<128x128xf32>
    %cst = arith.constant dense<0.000000e+00> : vector<128xf32>
    %4 = vector.multi_reduction <add>, %3, %cst [1] : vector<128x128xf32> to vector<128xf32>
    %5 = vector.shape_cast %4 : vector<128xf32> to vector<128x1xf32>
    %6 = tpu.transpose %5, [1, 0] : vector<128x1xf32> -> vector<1x128xf32>
    %c0_3 = arith.constant 0 : index
    %c0_4 = arith.constant 0 : index
    %7 = vector.load %arg5[%c0_3, %c0_4] : memref<1x128xf32, #tpu.memory_space<vmem>>, vector<1x128xf32>
    tpu.vector_store %arg5[%c0_3, %c0_4], %6 {strides = array<i32>} : memref<1x128xf32, #tpu.memory_space<vmem>>, vector<1x128xf32>,
    return
  }
  func.func @transform_0(%arg0: i32, %arg1: memref<128xi32, #tpu.memory_space<smem>>, %arg2: memref<128xi32, #tpu.memory_space<smem>>) -> (i32, i32) {
    %c0_i32 = arith.constant 0 : i32
    %c0_i32_0 = arith.constant 0 : i32
    %c0_i32_1 = arith.constant 0 : i32
    return %c0_i32, %c0_i32_0 : i32, i32
  }
  func.func @transform_1(%arg0: i32, %arg1: memref<128xi32, #tpu.memory_space<smem>>, %arg2: memref<128xi32, #tpu.memory_space<smem>>) -> (i32, i32) {
    %c0_i32 = arith.constant 0 : i32
    %c0_i32_0 = arith.constant 0 : i32
    %c0_i32_1 = arith.constant 0 : i32
    return %c0_i32, %c0_i32_0 : i32, i32
  }
  func.func @transform_2(%arg0: i32, %arg1: memref<128xi32, #tpu.memory_space<smem>>, %arg2: memref<128xi32, #tpu.memory_space<smem>>) -> (i32, i32) {
    %c0_i32 = arith.constant 0 : i32
    %c0_i32_0 = arith.constant 0 : i32
    return %arg0, %c0_i32 : i32, i32
  }
}

</mosaic_0001>

<bundles_post_ra>
// kernel: tpu_custom_call.1
= control target key start
LH: loop header
LB: loop body
LE: loop exit
PB: predicated region body
PF: predicated region fallthrough
CT: control target
= control target key end

     0   :  { %s534_s0 = inlined_call_operand.hbm [shape: s32[128], index: 0, kind: input, shape index: {}]   ;;  %s535_s2 = inlined_call_operand.hbm [shape: f32[64,128], index: 2, kind: input, shape index: {}]   ;;  %s536_s3 = inlined_call_operand.hbm [shape: f32[128,128], index: 3, kind: input, shape index: {}]   ;;  %s537_s4 = inlined_call_operand.hbm [shape: f32[1,128], index: 4, kind: output, shape index: {}]   ;;  %s538_s1 = inlined_call_operand.vmem [shape: s32[128], index: 1, kind: input, shape index: {}]  }
   0x1   :  { %s316_s17 = scalar_lea.hbm %s534_s0, 16 }
   0x2   :  { %p317_p0 = scmp.ne.s32.totalorder %s534_s0, %s316_s17  ;;  %p320_p1 = scmp.lt.u32.totalorder %s316_s17, %s534_s0 }
   0x4   :  { %p322_p2 = pnand %p320_p1, %p317_p0 }
   0x6   :  { %325 = shalt.err (!%p322_p2)  }
   0x7   :  { %s420_s22 = smov [#allocation4]   ;;  %s11_s27 = sshll.u32 %s538_s1, 4  ;;  %s12_s27 = int_to_ptr.vmem [resolvable:$true] %s11_s27 }
   0x8   :  { %10 = dma.hbm_to_smem %s534_s0, 16, %s420_s22, [#allocation3] }
   0x9   :  { %s326_s28 = scalar_lea.vmem %s12_s27, 16  ;;  %p331_p4 = scmp.lt.s32.totalorder %s12_s27, %s12_s27 }
   0xa   :  { %p327_p3 = scmp.ne.s32.totalorder %s12_s27, %s326_s28  ;;  %p332_p5 = scmp.lt.s32.totalorder %s326_s28, %s326_s28 }
   0xc   :  { %p333_p6 = por %p332_p5, %p331_p4 }
   0xe   :  { %p334_p7 = pnand %p333_p6, %p327_p3 }
  0x10   :  { %337 = shalt.err (!%p334_p7)  }
  0x11   :  { %s421_s29 = smov [#allocation5]  }
  0x12   :  { %14 = dma.vmem_to_smem %s12_s27, 16, %s421_s29, [#allocation3] }
  0x13   :  { %408 = dma.done.wait [#allocation3], 32 }
  0x14   :  { %409 = vsyncadd [#allocation3], 4294967264 }
  0x15   :  { %16 = sfence }
  0x16   :  { %17 = vsyncpa [#allocation7], 0 }
  0x17   :  { %18 = vsyncpa [#allocation10], 0 }
  0x18   :  { %19 = vsyncpa [#allocation8], 0  ;;  %s422_s0 = smov [#allocation6]   ;;  %s338_s6 = scalar_lea.hbm %s535_s2, 1024 }
  0x19   :  { %s25_s30 = sshll.u32 %s422_s0, 4  ;;  %p339_p8 = scmp.ne.s32.totalorder %s535_s2, %s338_s6  ;;  %s26_s30 = int_to_ptr.vmem [resolvable:$true] %s25_s30 }
  0x1a   :  { %p342_p9 = scmp.lt.u32.totalorder %s338_s6, %s535_s2 }
  0x1c   :  { %p344_p10 = pnand %p342_p9, %p339_p8 }
  0x1e   :  { %347 = shalt.err (!%p344_p10)
}
  0x1f   :  { %s348_s11 = scalar_lea.vmem %s26_s30, 1024  ;;  %p353_p12 = scmp.lt.s32.totalorder %s26_s30, %s26_s30 }
  0x20   :  { %p349_p11 = scmp.ne.s32.totalorder %s26_s30, %s348_s11  ;;  %p354_p13 = scmp.lt.s32.totalorder %s348_s11, %s348_s11 }
  0x22   :  { %p355_p0 = por %p354_p13, %p353_p12 }
  0x24   :  { %p356_p1 = pnand %p355_p0, %p349_p11 }
  0x26   :  { %359 = shalt.err (!%p356_p1)
}
  0x27   :  { %s423_s12 = smov 128   ;;  %s424_s13 = smov 8  }
  0x28   :  { %31 = dma.hbm_to_vmem [thread:$0]  %s535_s2, 1024, %s26_s30, [#allocation7], %s423_s12, %s423_s12, %s424_s13  }
  0x29   :  { %s425_s16 = smov [#allocation9]   ;;  %s360_s20 = scalar_lea.hbm %s536_s3, 2048 }
  0x2a   :  { %s37_s17 = sshll.u32 %s425_s16, 4  ;;  %p361_p2 = scmp.ne.s32.totalorder %s536_s3, %s360_s20  ;;  %s38_s17 = int_to_ptr.vmem [resolvable:$true] %s37_s17 }
  0x2b   :  { %p364_p3 = scmp.lt.u32.totalorder %s360_s20, %s536_s3 }
  0x2d   :  { %p366_p4 = pnand %p364_p3, %p361_p2 }
  0x2f   :  { %369 = shalt.err (!%p366_p4)
}
  0x30   :  { %s370_s25 = scalar_lea.vmem %s38_s17, 2048  ;;  %p375_p6 = scmp.lt.s32.totalorder %s38_s17, %s38_s17 }
  0x31   :  { %p371_p5 = scmp.ne.s32.totalorder %s38_s17, %s370_s25  ;;  %p376_p7 = scmp.lt.s32.totalorder %s370_s25, %s370_s25 }
  0x33   :  { %p377_p8 = por %p376_p7, %p375_p6 }
  0x35   :  { %p378_p9 = pnand %p377_p8, %p371_p5 }
  0x37   :  { %381 = shalt.err (!%p378_p9)
}
  0x38   :  { %43 = dma.hbm_to_vmem [thread:$0]  %s536_s3, 2048, %s38_s17, [#allocation10], %s423_s12, %s423_s12, %s424_s13  }
  0x39   :  { %410 = dma.done.wait [#allocation7], 1024  }
  0x3a   :  { %411 = vsyncadd [#allocation7], 4294966272 }
  0x3b   :  { %412 = dma.done.wait [#allocation10], 2048  }
  0x3c   :  { %413 = vsyncadd [#allocation10], 4294965248  ;;  %s491_s27 = smov 0  }
  0x3d LB: > { %s497_s28 = sshll.u32 %s418_s27, 3  ;;  %s56_s27 = sadd.s32 1, %s418_s27   ;;  %s418_s27 = sphi %s491_s27, %s56_s27  }
  0x3e   : > { %s59_s3 = sld [smem:[#allocation4 + %s497_s28]]  ;;  %s68_s0 = sadd.s32 1, %s497_s28 }
  0x3f   : > { %s60_s29 = sld [smem:[#allocation5 + %s497_s28]]  ;;  %s79_s5 = sadd.s32 2, %s497_s28 }
  0x40   : > { %s70_s30 = sld [smem:[#allocation4 + %s68_s0]]  ;;  %s90_s6 = sadd.s32 3, %s497_s28 }
  0x41   : > { %s71_s1 = sld [smem:[#allocation5 + %s68_s0]]  ;;  %s101_s13 = sadd.s32 4, %s497_s28 }
  0x42   : > { %s81_s7 = sld [smem:[#allocation4 + %s79_s5]]  ;;  %s112_s14 = sadd.s32 5, %s497_s28 }
  0x43   : > { %s82_s8 = sld [smem:[#allocation5 + %s79_s5]]  ;;  %s507_s19 = scalar_lea.vmem [#allocation2], %s497_s28 }
  0x44   : > { %s92_s9 = sld [smem:[#allocation4 + %s90_s6]]  ;;  %s61_s11 = scalar_lea.vmem [#allocation6], %s59_s3 }
  0x45   : > { %s93_s10 = sld [smem:[#allocation5 + %s90_s6]]  ;;  %v62_v0 = vld [vmem:[%s61_s11] sm:$0x1]  ;;  %s63_s12 = scalar_lea.vmem [#allocation9], %s60_s29 }
  0x46   : > { %v64_v1 = vld [vmem:[%s63_s12] sm:$0x1]  ;;  %s72_s15 = scalar_lea.vmem [#allocation6], %s70_s30  ;;  %s103_s17 = sld [smem:[#allocation4 + %s101_s13]] }
  0x47   : > { %v65_v2 = vmul.f32 %v64_v1, %v62_v0  ;;  %v73_v3 = vld [vmem:[%s72_s15] sm:$0x1]  ;;  %s74_s16 = scalar_lea.vmem [#allocation9], %s71_s1  ;;  %s104_s18 = sld [smem:[#allocation5 + %s101_s13]] }
  0x48   : > { %v75_v4 = vld [vmem:[%s74_s16] sm:$0x1]  ;;  %s83_s20 = scalar_lea.vmem [#allocation6], %s81_s7  ;;  %s114_s24 = sld [smem:[#allocation4 + %s112_s14]] }
  0x49   : > { %67 = vst [vmem:[%s507_s19] sm:$0x1] %v65_v2  ;;  %v76_v5 = vmul.f32 %v75_v4, %v73_v3  ;;  %v84_v6 = vld [vmem:[%s83_s20] sm:$0x1]  ;;  %s85_s21 = scalar_lea.vmem [#allocation9], %s82_s8  ;;  %s115_s25 = sld [smem:[#allocation5 + %s112_s14]] }
  0x4a   : > { %v86_v7 = vld [vmem:[%s85_s21] sm:$0x1]  ;;  %s94_s22 = scalar_lea.vmem [#allocation6], %s92_s9  ;;  %s123_s2 = sadd.s32 6, %s497_s28 }
  0x4b   : > { %288 = vst [vmem:[%s507_s19 + $0x1] sm:$0x1] %v76_v5  ;;  %v87_v8 = vmul.f32 %v86_v7, %v84_v6  ;;  %v95_v9 = vld [vmem:[%s94_s22] sm:$0x1]  ;;  %s96_s23 = scalar_lea.vmem [#allocation9], %s93_s10  ;;  %s134_s26 = sadd.s32 7, %s497_s28 }
  0x4c   : > { %v97_v10 = vld [vmem:[%s96_s23] sm:$0x1]  ;;  %s125_s3 = sld [smem:[#allocation4 + %s123_s2]]  ;;  %s105_s0 = scalar_lea.vmem [#allocation6], %s103_s17 }
  0x4d   : > { %v98_v11 = vmul.f32 %v97_v10, %v95_v9  ;;  %290 = vst [vmem:[%s507_s19 + $0x2] sm:$0x1] %v87_v8  ;;  %s126_s29 = sld [smem:[#allocation5 + %s123_s2]]  ;;  %v106_v12 = vld [vmem:[%s105_s0] sm:$0x1]  ;;  %s107_s30 = scalar_lea.vmem [#allocation9], %s104_s18 }
  0x4e   : > { %v108_v13 = vld [vmem:[%s107_s30] sm:$0x1]  ;;  %s136_s1 = sld [smem:[#allocation4 + %s134_s26]]  ;;  %s116_s6 = scalar_lea.vmem [#allocation6], %s114_s24 }
  0x4f   : > { %292 = vst [vmem:[%s507_s19 + $0x3] sm:$0x1] %v98_v11  ;;  %s137_s5 = sld [smem:[#allocation5 + %s134_s26]]  ;;  %v109_v14 = vmul.f32 %v108_v13, %v106_v12  ;;  %v117_v15 = vld [vmem:[%s116_s6] sm:$0x1]  ;;  %s118_s7 = scalar_lea.vmem [#allocation9], %s115_s25 }
  0x50   : > { %v119_v16 = vld [vmem:[%s118_s7] sm:$0x1]  ;;  %p53_p10 = scmp.ge.s32.totalorder %s56_s27, 16  }
  0x51   : > { %294 = vst [vmem:[%s507_s19 + $0x4] sm:$0x1] %v109_v14  ;;  %v120_v17 = vmul.f32 %v119_v16, %v117_v15  ;;  %s426_s27 = smov (%p53_p10), [#allocation11]  }
  0x52   : > { %s127_s28 = scalar_lea.vmem [#allocation6], %s125_s3  ;;  %s232_s11 = sshll.u32 (%p53_p10), %s426_s27, 4  ;;  %s233_s11 = int_to_ptr.vmem [resolvable:$true] %s232_s11 }
  0x53   : > { %v128_v18 = vld [vmem:[%s127_s28] sm:$0x1]  ;;  %s129_s8 = scalar_lea.vmem [#allocation9], %s126_s29  ;;  %296 = vst [vmem:[%s507_s19 + $0x5] sm:$0x1] %v120_v17  ;;  %55 = sbr.rel (!%p53_p10) target bundleno = 61 (0x3d), region = 67 }
  0x54   : > { %v130_v19 = vld [vmem:[%s129_s8] sm:$0x1]  ;;  %s138_s9 = scalar_lea.vmem [#allocation6], %s136_s1  ;;  %s382_s12 = scalar_lea.vmem (%p53_p10), %s233_s11, 16 }
  0x55   : > { %v131_v20 = vmul.f32 %v130_v19, %v128_v18  ;;  %v139_v21 = vld [vmem:[%s138_s9] sm:$0x1]  ;;  %s140_s10 = scalar_lea.vmem [#allocation9], %s137_s5  ;;  %p383_p11 = scmp.ne.s32.totalorder (%p53_p10), %s233_s11, %s382_s12 }
  0x56   : > { %v141_v22 = vld [vmem:[%s140_s10] sm:$0x1]  ;;  %s386_s13 = scalar_lea.vmem (%p53_p10), %s233_s11, 32  ;;  %p387_p12 = scmp.lt.s32.totalorder (%p53_p10), %s233_s11, %s233_s11 }
  0x57   : > { %298 = vst [vmem:[%s507_s19 + $0x6] sm:$0x1] %v131_v20  ;;  %v142_v23 = vmul.f32 %v141_v22, %v139_v21  ;;  %p388_p13 = scmp.lt.s32.totalorder (%p53_p10), %s386_s13, %s382_s12 }
  0x59   : > { %300 = vst [vmem:[%s507_s19 + $0x7] sm:$0x1] %v142_v23  ;;  %p389_p0 = por (%p53_p10), %p388_p13, %p387_p12 }
  0x5b   :  { %p390_p1 = pnand %p389_p0, %p383_p11 }
  0x60   :  { %v145_v24 = vld [vmem:[#allocation2] sm:$0xff]  ;;  %v147_v25 = vld [vmem:[#allocation2 + $0x10] sm:$0xff]  ;;  %v146_v26 = vld [vmem:[#allocation2 + $0x8] sm:$0xff] }
  0x61   :  { %161 = vadd.xlane.f32.xlu0 %v145_v24  ;;  %165 = vadd.xlane.f32.xlu1 %v147_v25  ;;  %v148_v27 = vld [vmem:[#allocation2 + $0x18] sm:$0xff]  ;;  %v149_v28 = vld [vmem:[#allocation2 + $0x20] sm:$0xff]  ;;  %v150_v29 = vld [vmem:[#allocation2 + $0x28] sm:$0xff] }
  0x62   :  { %v151_v30 = vld [vmem:[#allocation2 + $0x30] sm:$0xff]  ;;  %v152_v31 = vld [vmem:[#allocation2 + $0x38] sm:$0xff]  ;;  %v153_v32 = vld [vmem:[#allocation2 + $0x40] sm:$0xff] }
  0x63   :  { %v154_v33 = vld [vmem:[#allocation2 + $0x48] sm:$0xff]  ;;  %v155_v34 = vld [vmem:[#allocation2 + $0x50] sm:$0xff]  ;;  %v156_v35 = vld [vmem:[#allocation2 + $0x58] sm:$0xff] }
  0x64   :  { %v157_v36 = vld [vmem:[#allocation2 + $0x60] sm:$0xff]  ;;  %v158_v37 = vld [vmem:[#allocation2 + $0x68] sm:$0xff]  ;;  %v159_v38 = vld [vmem:[#allocation2 + $0x70] sm:$0xff] }
  0x65   :  { %163 = vadd.xlane.f32.xlu0 %v146_v26  ;;  %167 = vadd.xlane.f32.xlu1 %v148_v27  ;;  %v160_v39 = vld [vmem:[#allocation2 + $0x78] sm:$0xff] }
  0x69   :  { %169 = vadd.xlane.f32.xlu0 %v149_v28  ;;  %171 = vadd.xlane.f32.xlu1 %v150_v29 }
  0x6d   :  { %173 = vadd.xlane.f32.xlu0 %v151_v30  ;;  %175 = vadd.xlane.f32.xlu1 %v152_v31 }
  0x71   :  { %177 = vadd.xlane.f32.xlu0 %v153_v32  ;;  %179 = vadd.xlane.f32.xlu1 %v154_v33 }
  0x75   :  { %181 = vadd.xlane.f32.xlu0 %v155_v34  ;;  %183 = vadd.xlane.f32.xlu1 %v156_v35 }
  0x79   :  { %185 = vadd.xlane.f32.xlu0 %v157_v36  ;;  %187 = vadd.xlane.f32.xlu1 %v158_v37 }
  0x7d   :  { %189 = vadd.xlane.f32.xlu0 %v159_v38  ;;  %191 = vadd.xlane.f32.xlu1 %v160_v39 }
  0xee   :  { %v162_v40 = vpop.xlane.xlu0 %161  ;;  %v166_v42 = vpop.xlane.xlu1 %165 }
  0xef   :  { %193 = vxpose.xlu0.b32.start [1/16] (narrow) %v162_v40, 8 }
  0xf2   :  { %v164_v41 = vpop.xlane.xlu0 %163  ;;  %v168_v43 = vpop.xlane.xlu1 %167 }
  0xf3   :  { %194 = vxpose.xlu0.b32.cont [2/16] (narrow) %v164_v41, 8 }
  0xf6   :  { %v170_v44 = vpop.xlane.xlu0 %169  ;;  %v172_v45 = vpop.xlane.xlu1 %171 }
  0xf7   :  { %195 = vxpose.xlu0.b32.cont [3/16] (narrow) %v166_v42, 8 }
  0xfa   :  { %v174_v46 = vpop.xlane.xlu0 %173  ;;  %v176_v47 = vpop.xlane.xlu1 %175 }
  0xfb   :  { %196 = vxpose.xlu0.b32.cont [4/16] (narrow) %v168_v43, 8 }
  0xfe   :  { %v178_v48 = vpop.xlane.xlu0 %177  ;;  %v180_v49 = vpop.xlane.xlu1 %179 }
  0xff   :  { %197 = vxpose.xlu0.b32.cont [5/16] (narrow) %v170_v44, 8 }
 0x102   :  { %v182_v50 = vpop.xlane.xlu0 %181  ;;  %v184_v51 = vpop.xlane.xlu1 %183 }
 0x103   :  { %198 = vxpose.xlu0.b32.cont [6/16] (narrow) %v172_v45, 8 }
 0x106   :  { %v186_v52 = vpop.xlane.xlu0 %185  ;;  %v188_v53 = vpop.xlane.xlu1 %187 }
 0x107   :  { %199 = vxpose.xlu0.b32.cont [7/16] (narrow) %v174_v46, 8 }
 0x10a   :  { %v190_v54 = vpop.xlane.xlu0 %189  ;;  %v192_v55 = vpop.xlane.xlu1 %191 }
 0x10b   :  { %200 = vxpose.xlu0.b32.cont [8/16] (narrow) %v176_v47, 8 }
 0x10f   :  { %201 = vxpose.xlu0.b32.cont [9/16] (narrow) %v178_v48, 8 }
 0x113   :  { %202 = vxpose.xlu0.b32.cont [10/16] (narrow) %v180_v49, 8 }
 0x117   :  { %203 = vxpose.xlu0.b32.cont [11/16] (narrow) %v182_v50, 8 }
 0x11b   :  { %204 = vxpose.xlu0.b32.cont [12/16] (narrow) %v184_v51, 8 }
 0x11f   :  { %205 = vxpose.xlu0.b32.cont [13/16] (narrow) %v186_v52, 8 }
 0x123   :  { %206 = vxpose.xlu0.b32.cont [14/16] (narrow) %v188_v53, 8 }
 0x127   :  { %207 = vxpose.xlu0.b32.cont [15/16] (narrow) %v190_v54, 8 }
 0x12b   :  { %208 = vxpose.xlu0.b32.end [16/16] (narrow) %v192_v55, 8 }
 0x16f   :  { %v209_v56 = vpop.trf.xlu0 }
 0x170   :  { %225 = vst [vmem:[#allocation11] sm:$0x1] %v209_v56 }
 0x171   :  { %393 = shalt.err (!%p390_p1)
}
 0x172   :  { %s394_s16 = scalar_lea.hbm %s537_s4, 16 }
 0x173   :  { %p395_p2 = scmp.ne.s32.totalorder %s537_s4, %s394_s16  ;;  %p398_p3 = scmp.lt.u32.totalorder %s394_s16, %s537_s4 }
 0x175   :  { %p400_p4 = pnand %p398_p3, %p395_p2 }
 0x177   :  { %403 = shalt.err (!%p400_p4)
}
 0x178   :  { %235 = dma.vmem_to_hbm [thread:$0]  %s233_s11, 16, %s537_s4, [#allocation8]  }
 0x179   :  { %414 = dma.done.wait [#allocation8], 16  }
 0x17a   :  { %415 = vsyncadd [#allocation8], 4294967280 }
 0x17b   :  { %239 = vsyncpa [#allocation7], 1 }
 0x17c   :  { %240 = vsyncpa [#allocation10], 1 }
 0x17d   :  { %241 = vsyncpa [#allocation8], 1 }

</bundles_post_ra>
